<compile_context>
chip_gen: v7x
topology: tpu7x:2x2x1
jax: 0.10.0
libtpu: 0.0.40
codegen_flags: <defaults>
</compile_context>

<pallas_src>
import functools

import jax
import jax.numpy as jnp
import numpy as np
from jax.experimental import pallas as pl
from jax.experimental.pallas import tpu as pltpu


def _choose_tile_d(D: int, S: int, M: int, itemsize: int = 4,
                   budget_bytes: int = 2 << 20) -> int:
    """Pick the lane tile tD for the feature-channel axis.

    Keeps one (M, S, tD) slab around `budget_bytes`, so double-buffered
    input + output blocks stay well inside the scoped-VMEM default on every
    generation (including v7x's 64 MiB physical / 32 MiB scoped VMEM).
    """
    if D % 128 != 0:
        # Blocks must either be 128-multiples in lanes or span the full axis.
        return D
    td = max(128, (budget_bytes // (M * S * itemsize)) // 128 * 128)
    td = min(td, D)
    while D % td != 0:          # shrink to a 128-multiple divisor of D
        td -= 128
    return max(td, 128)


def _seqnorm_se3_kernel(x_ref, gamma_ref, beta_ref, o_ref, *, eps: float):
    # x_ref block: (1, M, S, tD); gamma/beta blocks: (1, tD); o_ref like x_ref.
    n_m = x_ref.shape[1]
    s_len = x_ref.shape[2]

    # ||x||^2 over the tiny leading M axis: explicit VPU adds on dense (S, tD)
    # vregs -- no XLU cross-lane reduction for the norm.
    x0 = x_ref[0, 0].astype(jnp.float32)
    sq = x0 * x0
    for m in range(1, n_m):
        xm = x_ref[0, m].astype(jnp.float32)
        sq = sq + xm * xm
    feat_norms = jnp.sqrt(sq)                                    # (S, tD)

    # Reciprocal computed once on the small (S, tD) tensor (factor-of-M fewer
    # divides, no full-slab `normed_feats` temporary).  approx=True (EUP vrcp)
    # is available when looser tolerances are acceptable.
    inv_norm = pl.reciprocal(feat_norms + eps, approx=False)     # (S, tD)

    # Unbiased (ddof=1) std over the sequence axis: sublane reduce on a small
    # (S, tD) tensor.  NOTE: like torch.std, this yields NaN when S == 1.
    mean = jnp.mean(feat_norms, axis=0, keepdims=True)           # (1, tD)
    centered = feat_norms - mean
    var = jnp.sum(centered * centered, axis=0, keepdims=True) / (s_len - 1)
    inv_std = pl.reciprocal(jnp.sqrt(var) + eps, approx=False)   # (1, tD)

    gamma = gamma_ref[...].astype(jnp.float32)                   # (1, tD)
    beta = beta_ref[...].astype(jnp.float32)                     # (1, tD)

    # ReLU(feat_norms/(std+eps) * beta + gamma) fused with 1/(norm+eps) into a
    # single (S, tD) scale; the full slab is then scaled in one dense pass with
    # unmasked, full-lane stores.
    transformed = feat_norms * (inv_std * beta) + gamma          # (S, tD)
    scale = jnp.maximum(transformed, 0.0) * inv_norm             # (S, tD)

    for m in range(n_m):
        o_ref[0, m] = (x_ref[0, m].astype(jnp.float32) * scale).astype(o_ref.dtype)


def seq_norm_se3(feats: jax.Array, gamma: jax.Array, beta: jax.Array,
                 eps: float = 1e-4) -> jax.Array:
    """feats: (B, S, D, M); gamma, beta: (D, 1). Returns (B, S, D, M)."""
    B, S, D, M = feats.shape
    tD = _choose_tile_d(D, S, M, itemsize=feats.dtype.itemsize)

    # Lane-dense layout: channels D -> lanes, sequence S -> sublanes, M leading.
    x = jnp.transpose(feats, (0, 3, 1, 2))                       # (B, M, S, D)
    g = gamma.reshape(1, D)                                      # lane-aligned params
    b = beta.reshape(1, D)

    kernel = functools.partial(_seqnorm_se3_kernel, eps=eps)
    out = pl.pallas_call(
        kernel,
        out_shape=jax.ShapeDtypeStruct((B, M, S, D), feats.dtype),
        grid=(B, D // tD),
        in_specs=[
            pl.BlockSpec((1, M, S, tD), lambda i, j: (i, 0, 0, j)),
            pl.BlockSpec((1, tD), lambda i, j: (0, j)),
            pl.BlockSpec((1, tD), lambda i, j: (0, j)),
        ],
        out_specs=pl.BlockSpec((1, M, S, tD), lambda i, j: (i, 0, 0, j)),
        compiler_params=pltpu.CompilerParams(
            dimension_semantics=("parallel", "parallel"),
            # >= default scoped limit on all generations, <= v7x physical VMEM.
            vmem_limit_bytes=32 * 1024 * 1024,
        ),
    )(x, g, b)

    return jnp.transpose(out, (0, 2, 3, 1))                      # back to (B, S, D, M)


def _reference(feats, gamma, beta, eps=1e-4):
    feat_norms = jnp.linalg.norm(feats, axis=-1, keepdims=True)
    normed_feats = feats / (feat_norms + eps)
    std = jnp.std(feat_norms, axis=1, keepdims=True, ddof=1)
    feat_norms = feat_norms / (std + eps)
    transformed = feat_norms * beta + gamma
    return jnp.maximum(transformed, 0.0) * normed_feats


if __name__ == "__main__":
    # Module config: dim = D feature channels; SE(3) degree-1 features -> M = 3.
    B, S, D, M = 2, 8, 4, 3
    gamma_init, beta_init, eps = 1e-5, 1.0, 1e-4

    key = jax.random.PRNGKey(0)
    feats = jax.random.normal(key, (B, S, D, M), dtype=jnp.float32)

    # Deterministic parameter init, exactly like __init__: ones * init_value.
    gamma = jnp.ones((D, 1), dtype=jnp.float32) * gamma_init
    beta = jnp.ones((D, 1), dtype=jnp.float32) * beta_init

    out = seq_norm_se3(feats, gamma, beta, eps=eps)
    out = jax.block_until_ready(out)

    ref = _reference(feats, gamma, beta, eps=eps)
    np.testing.assert_allclose(np.asarray(out), np.asarray(ref), rtol=1e-5, atol=1e-5)

    print("KERNEL_OK")
</pallas_src>

<mosaic_0001>
module attributes {stable_mosaic.version = 11 : i64} {
  func.func @_seqnorm_se3_kernel(%arg0: i32, %arg1: i32, %arg2: memref<1x3x8x4xf32, #tpu.memory_space<vmem>>, %arg3: memref<1x4xf32, #tpu.memory_space<vmem>>, %arg4: memref<1x4xf32, #tpu.memory_space<vmem>>, %arg5: memref<1x3x8x4xf32, #tpu.memory_space<vmem>>) attributes {dimension_semantics = [#tpu.dimension_semantics<parallel>, #tpu.dimension_semantics<parallel>], iteration_bounds = array<i64: 2, 1>, scalar_prefetch = 0 : i64, scratch_operands = 0 : i64, tpu.core_type = #tpu.core_type<tc>, window_params = [{transform_indices = @transform_0, window_bounds = array<i64: 1, 3, 8, 4>}, {transform_indices = @transform_1, window_bounds = array<i64: 1, 4>}, {transform_indices = @transform_2, window_bounds = array<i64: 1, 4>}, {transform_indices = @transform_3, window_bounds = array<i64: 1, 3, 8, 4>}]} {
    %c0 = arith.constant 0 : index
    %c0_0 = arith.constant 0 : index
    %c0_1 = arith.constant 0 : index
    %c0_2 = arith.constant 0 : index
    %0 = vector.load %arg2[%c0, %c0_0, %c0_1, %c0_2] : memref<1x3x8x4xf32, #tpu.memory_space<vmem>>, vector<1x1x8x4xf32>
    %1 = vector.shape_cast %0 : vector<1x1x8x4xf32> to vector<8x4xf32>
    %2 = arith.mulf %1, %1 : vector<8x4xf32>
    %c0_3 = arith.constant 0 : index
    %c1 = arith.constant 1 : index
    %c0_4 = arith.constant 0 : index
    %c0_5 = arith.constant 0 : index
    %3 = vector.load %arg2[%c0_3, %c1, %c0_4, %c0_5] : memref<1x3x8x4xf32, #tpu.memory_space<vmem>>, vector<1x1x8x4xf32>
    %4 = vector.shape_cast %3 : vector<1x1x8x4xf32> to vector<8x4xf32>
    %5 = arith.mulf %4, %4 : vector<8x4xf32>
    %6 = arith.addf %2, %5 : vector<8x4xf32>
    %c0_6 = arith.constant 0 : index
    %c2 = arith.constant 2 : index
    %c0_7 = arith.constant 0 : index
    %c0_8 = arith.constant 0 : index
    %7 = vector.load %arg2[%c0_6, %c2, %c0_7, %c0_8] : memref<1x3x8x4xf32, #tpu.memory_space<vmem>>, vector<1x1x8x4xf32>
    %8 = vector.shape_cast %7 : vector<1x1x8x4xf32> to vector<8x4xf32>
    %9 = arith.mulf %8, %8 : vector<8x4xf32>
    %10 = arith.addf %6, %9 : vector<8x4xf32>
    %11 = math.sqrt %10 : vector<8x4xf32>
    %cst = arith.constant 9.99999974E-5 : f32
    %12 = vector.broadcast %cst : f32 to vector<8x4xf32>
    %13 = arith.addf %11, %12 : vector<8x4xf32>
    %14 = tpu.reciprocal %13 : vector<8x4xf32> -> vector<8x4xf32>
    %cst_9 = arith.constant dense<0.000000e+00> : vector<4xf32>
    %15 = vector.multi_reduction <add>, %11, %cst_9 [0] : vector<8x4xf32> to vector<4xf32>
    %16 = vector.shape_cast %15 : vector<4xf32> to vector<1x4xf32>
    %cst_10 = arith.constant 8.000000e+00 : f32
    %17 = vector.broadcast %cst_10 : f32 to vector<1x4xf32>
    %18 = arith.divf %16, %17 : vector<1x4xf32>
    %19 = vector.broadcast %18 : vector<1x4xf32> to vector<8x4xf32>
    %20 = arith.subf %11, %19 : vector<8x4xf32>
    %21 = arith.mulf %20, %20 : vector<8x4xf32>
    %cst_11 = arith.constant dense<0.000000e+00> : vector<4xf32>
    %22 = vector.multi_reduction <add>, %21, %cst_11 [0] : vector<8x4xf32> to vector<4xf32>
    %23 = vector.shape_cast %22 : vector<4xf32> to vector<1x4xf32>
    %cst_12 = arith.constant 7.000000e+00 : f32
    %24 = vector.broadcast %cst_12 : f32 to vector<1x4xf32>
    %25 = arith.divf %23, %24 : vector<1x4xf32>
    %26 = math.sqrt %25 : vector<1x4xf32>
    %cst_13 = arith.constant 9.99999974E-5 : f32
    %27 = vector.broadcast %cst_13 : f32 to vector<1x4xf32>
    %28 = arith.addf %26, %27 : vector<1x4xf32>
    %29 = tpu.reciprocal %28 : vector<1x4xf32> -> vector<1x4xf32>
    %c0_14 = arith.constant 0 : index
    %c0_15 = arith.constant 0 : index
    %30 = vector.load %arg3[%c0_14, %c0_15] : memref<1x4xf32, #tpu.memory_space<vmem>>, vector<1x4xf32>
    %c0_16 = arith.constant 0 : index
    %c0_17 = arith.constant 0 : index
    %31 = vector.load %arg4[%c0_16, %c0_17] : memref<1x4xf32, #tpu.memory_space<vmem>>, vector<1x4xf32>
    %32 = arith.mulf %29, %31 : vector<1x4xf32>
    %33 = vector.broadcast %32 : vector<1x4xf32> to vector<8x4xf32>
    %34 = arith.mulf %11, %33 : vector<8x4xf32>
    %35 = vector.broadcast %30 : vector<1x4xf32> to vector<8x4xf32>
    %36 = arith.addf %34, %35 : vector<8x4xf32>
    %cst_18 = arith.constant 0.000000e+00 : f32
    %37 = vector.broadcast %cst_18 : f32 to vector<8x4xf32>
    %38 = arith.maximumf %36, %37 : vector<8x4xf32>
    %39 = arith.mulf %38, %14 : vector<8x4xf32>
    %c0_19 = arith.constant 0 : index
    %c0_20 = arith.constant 0 : index
    %c0_21 = arith.constant 0 : index
    %c0_22 = arith.constant 0 : index
    %40 = vector.load %arg2[%c0_19, %c0_20, %c0_21, %c0_22] : memref<1x3x8x4xf32, #tpu.memory_space<vmem>>, vector<1x1x8x4xf32>
    %41 = vector.shape_cast %40 : vector<1x1x8x4xf32> to vector<8x4xf32>
    %42 = arith.mulf %41, %39 : vector<8x4xf32>
    %c0_23 = arith.constant 0 : index
    %c0_24 = arith.constant 0 : index
    %c0_25 = arith.constant 0 : index
    %c0_26 = arith.constant 0 : index
    %43 = vector.load %arg5[%c0_23, %c0_24, %c0_25, %c0_26] : memref<1x3x8x4xf32, #tpu.memory_space<vmem>>, vector<1x1x8x4xf32>
    %44 = vector.shape_cast %43 : vector<1x1x8x4xf32> to vector<8x4xf32>
    %45 = vector.shape_cast %42 : vector<8x4xf32> to vector<1x1x8x4xf32>
    tpu.vector_store %arg5[%c0_23, %c0_24, %c0_25, %c0_26], %45 {strides = array<i32>} : memref<1x3x8x4xf32, #tpu.memory_space<vmem>>, vector<1x1x8x4xf32>,
    %c0_27 = arith.constant 0 : index
    %c1_28 = arith.constant 1 : index
    %c0_29 = arith.constant 0 : index
    %c0_30 = arith.constant 0 : index
    %46 = vector.load %arg2[%c0_27, %c1_28, %c0_29, %c0_30] : memref<1x3x8x4xf32, #tpu.memory_space<vmem>>, vector<1x1x8x4xf32>
    %47 = vector.shape_cast %46 : vector<1x1x8x4xf32> to vector<8x4xf32>
    %48 = arith.mulf %47, %39 : vector<8x4xf32>
    %c0_31 = arith.constant 0 : index
    %c1_32 = arith.constant 1 : index
    %c0_33 = arith.constant 0 : index
    %c0_34 = arith.constant 0 : index
    %49 = vector.load %arg5[%c0_31, %c1_32, %c0_33, %c0_34] : memref<1x3x8x4xf32, #tpu.memory_space<vmem>>, vector<1x1x8x4xf32>
    %50 = vector.shape_cast %49 : vector<1x1x8x4xf32> to vector<8x4xf32>
    %51 = vector.shape_cast %48 : vector<8x4xf32> to vector<1x1x8x4xf32>
    tpu.vector_store %arg5[%c0_31, %c1_32, %c0_33, %c0_34], %51 {strides = array<i32>} : memref<1x3x8x4xf32, #tpu.memory_space<vmem>>, vector<1x1x8x4xf32>,
    %c0_35 = arith.constant 0 : index
    %c2_36 = arith.constant 2 : index
    %c0_37 = arith.constant 0 : index
    %c0_38 = arith.constant 0 : index
    %52 = vector.load %arg2[%c0_35, %c2_36, %c0_37, %c0_38] : memref<1x3x8x4xf32, #tpu.memory_space<vmem>>, vector<1x1x8x4xf32>
    %53 = vector.shape_cast %52 : vector<1x1x8x4xf32> to vector<8x4xf32>
    %54 = arith.mulf %53, %39 : vector<8x4xf32>
    %c0_39 = arith.constant 0 : index
    %c2_40 = arith.constant 2 : index
    %c0_41 = arith.constant 0 : index
    %c0_42 = arith.constant 0 : index
    %55 = vector.load %arg5[%c0_39, %c2_40, %c0_41, %c0_42] : memref<1x3x8x4xf32, #tpu.memory_space<vmem>>, vector<1x1x8x4xf32>
    %56 = vector.shape_cast %55 : vector<1x1x8x4xf32> to vector<8x4xf32>
    %57 = vector.shape_cast %54 : vector<8x4xf32> to vector<1x1x8x4xf32>
    tpu.vector_store %arg5[%c0_39, %c2_40, %c0_41, %c0_42], %57 {strides = array<i32>} : memref<1x3x8x4xf32, #tpu.memory_space<vmem>>, vector<1x1x8x4xf32>,
    return
  }
  func.func @transform_0(%arg0: i32, %arg1: i32) -> (i32, i32, i32, i32) {
    %c0_i32 = arith.constant 0 : i32
    %c0_i32_0 = arith.constant 0 : i32
    %c0_i32_1 = arith.constant 0 : i32
    return %arg0, %c0_i32, %c0_i32_0, %arg1 : i32, i32, i32, i32
  }
  func.func @transform_1(%arg0: i32, %arg1: i32) -> (i32, i32) {
    %c0_i32 = arith.constant 0 : i32
    %c0_i32_0 = arith.constant 0 : i32
    return %c0_i32, %arg1 : i32, i32
  }
  func.func @transform_2(%arg0: i32, %arg1: i32) -> (i32, i32) {
    %c0_i32 = arith.constant 0 : i32
    %c0_i32_0 = arith.constant 0 : i32
    return %c0_i32, %arg1 : i32, i32
  }
  func.func @transform_3(%arg0: i32, %arg1: i32) -> (i32, i32, i32, i32) {
    %c0_i32 = arith.constant 0 : i32
    %c0_i32_0 = arith.constant 0 : i32
    %c0_i32_1 = arith.constant 0 : i32
    return %arg0, %c0_i32, %c0_i32_0, %arg1 : i32, i32, i32, i32
  }
}

</mosaic_0001>

<bundles_post_ra>
// kernel: tpu_custom_call.1
= control target key start
LH: loop header
LB: loop body
LE: loop exit
PB: predicated region body
PF: predicated region fallthrough
CT: control target
= control target key end

     0   :  { %s509_s12 = smov 0   ;;  %s511_s13 = smov 0   ;;  %s560_s0 = inlined_call_operand.vmem [shape: f32[2,3,8,4], index: 0, kind: input, shape index: {}]   ;;  %s561_s1 = inlined_call_operand.vmem [shape: f32[1,4], index: 1, kind: input, shape index: {}]   ;;  %s562_s2 = inlined_call_operand.vmem [shape: f32[1,4], index: 2, kind: input, shape index: {}]   ;;  %s563_s3 = inlined_call_operand.vmem [shape: f32[2,3,8,4], index: 3, kind: output, shape index: {}]  }
   0x1   :  { %s513_s14 = smov 0  }
   0x2 LB: > { %s25_s15 = sadd.s32 1, %s483_s13  ;;  %p420_p0 = scmp.ge.s32.totalorder %s487_s14, 1  ;;  %s487_s14 = sphi %s513_s14, %s13_s14   ;;  %s483_s13 = sphi %s511_s13, %s565_s13   ;;  %s479_s12 = sphi %s509_s12, %s564_s12  }
   0x3   : > { %p27_p1 = scmp.ge.s32.totalorder %s25_s15, 2  ;;  %p172_p2 = scmp.lt.s32.totalorder %s487_s14, 3 }
   0x5   : > { %s567_s15 = smov (%p27_p1, %s25_s15), 0  ;;  %p173_p3 = pnand %p420_p0, %p172_p2 }
   0x6   : > { %p208_p4 = scmp.lt.s32.totalorder (!%p173_p3), %s479_s12, 1  ;;  %vm249_vm2 = vcmask (!%p173_p3), 31744   ;;  %v282_v37 = vlaneseq (!%p173_p3)  ;;  %v280_v40 = vld [vmem:[%s562_s2] sm:$0x1] (!%p173_p3) }
   0x7   : > { %176 = sbr.rel (%p173_p3) target bundleno = 118 (0x76), region = 32  ;;  %v425_v45 = vld [vmem:[%s561_s1] ss:$0 sm:$0xff] (!%p173_p3) }
   0x8   : > { %v283_v39 = vshrl.u32 (!%p173_p3), %v282_v37, 7 }
   0xa   : > { %v284_v41 = vsub.s32 (!%p173_p3), 0, %v283_v39 }
   0xe   : > { %s569_s12 = smov (!%p208_p4, %s479_s12), 1 }
   0xf   : > { %s432_s16 = smul.u32 24, %s569_s12 }
  0x11   : > { %s215_s19 = scalar_lea.vmem %s560_s0, %s432_s16  ;;  %s229_s26 = scalar_lea.vmem %s563_s3, %s432_s16 }
  0x12   : > { %v230_v0 = vld [vmem:[%s215_s19] sm:$0xff]  ;;  %v423_v1 = vld [vmem:[%s215_s19 + $0x8] sm:$0xff]  ;;  %v424_v2 = vld [vmem:[%s215_s19 + $0x10] sm:$0xff] }
  0x13   : > { %v231_v3 = vmul.f32 %v230_v0, %v230_v0  ;;  %v234_v4 = vmul.f32 %v423_v1, %v423_v1  ;;  %v238_v5 = vmul.f32 %v424_v2, %v424_v2 }
  0x15   : > { %v235_v6 = vadd.f32 %v234_v4, %v231_v3 }
  0x17   : > { %v239_v7 = vadd.f32 %v238_v5, %v235_v6 }
  0x19   : > { %457 = vrsqrt.f32 %v239_v7  ;;  %vm242_vm0 = vcmp.eq.f32.partialorder %v239_v7, inf  ;;  %v245_v9 = vand.u32 2147483648, %v239_v7  ;;  %vm244_vm1 = vcmp.eq.f32.partialorder %v239_v7, 0.0 }
  0x23   : > { %v458_v8 = vpop.eup %457 }
  0x24   : > { %v241_v10 = vmul.f32 %v458_v8, %v239_v7 }
  0x26   : > { %v243_v11 = vsel %vm242_vm0, %v239_v7, %v241_v10 }
  0x27   : > { %v246_v12 = vsel %vm244_vm1, %v245_v9, %v243_v11 }
  0x28   : > { %v250_v13 = vsel %vm249_vm2, %v246_v12, 0.0  ;;  %v247_v38 = vadd.f32 0.0001, %v246_v12 }
  0x29   : > { %v251_v14 = vrot.slane %v250_v13, 4 }
  0x2b   : > { %v252_v15 = vadd.f32 %v251_v14, %v250_v13 }
  0x2d   : > { %v253_v16 = vrot.slane %v252_v15, 2 }
  0x2f   : > { %v254_v17 = vadd.f32 %v253_v16, %v252_v15 }
  0x31   : > { %v255_v18 = vrot.slane %v254_v17, 1 }
  0x33   : > { %v256_v19 = vadd.f32 %v255_v18, %v254_v17 }
  0x35   : > { %v258_v20 = vmul.f32 0.125, %v256_v19 }
  0x37   : > { %v259_v21 = vsub.f32 %v246_v12, %v258_v20 }
  0x39   : > { %v260_v22 = vmul.f32 %v259_v21, %v259_v21 }
  0x3b   : > { %v261_v23 = vsel %vm249_vm2, %v260_v22, 0.0 }
  0x3c   : > { %v262_v24 = vrot.slane %v261_v23, 4 }
  0x3e   : > { %v263_v25 = vadd.f32 %v262_v24, %v261_v23 }
  0x40   : > { %v264_v26 = vrot.slane %v263_v25, 2 }
  0x42   : > { %v265_v27 = vadd.f32 %v264_v26, %v263_v25 }
  0x44   : > { %v266_v28 = vrot.slane %v265_v27, 1 }
  0x46   : > { %v267_v29 = vadd.f32 %v266_v28, %v265_v27 }
  0x48   : > { %v269_v30 = vmul.f32 0.14285715, %v267_v29 }
  0x4a   : > { %459 = vrsqrt.f32 %v269_v30  ;;  %vm272_vm3 = vcmp.eq.f32.partialorder %v269_v30, inf  ;;  %v275_v32 = vand.u32 2147483648, %v269_v30  ;;  %vm274_vm4 = vcmp.eq.f32.partialorder %v269_v30, 0.0 }
  0x54   : > { %v460_v31 = vpop.eup %459 }
  0x55   : > { %v271_v33 = vmul.f32 %v460_v31, %v269_v30 }
  0x57   : > { %v273_v34 = vsel %vm272_vm3, %v269_v30, %v271_v33 }
  0x58   : > { %v276_v35 = vsel %vm274_vm4, %v275_v32, %v273_v34 }
  0x59   : > { %v277_v36 = vadd.f32 0.0001, %v276_v35 }
  0x5b   : > { %461 = vrcp.f32 %v277_v36 }
  0x5c   : > { %463 = vrcp.f32 %v247_v38 }
  0x65   : > { %v462_v42 = vpop.eup %461 }
  0x66   : > { %v281_v43 = vmul.f32 %v462_v42, %v280_v40  ;;  %v464_v48 = vpop.eup %463 }
  0x68   : > { %v285_v44 = vrot.slane %v281_v43, %v284_v41 }
  0x6a   : > { %v286_v46 = vmul.f32 %v285_v44, %v246_v12 }
  0x6c   : > { %v293_v47 = vadd.f32 %v425_v45, %v286_v46 }
  0x6e   : > { %v294_v49 = vmax.f32 %v293_v47, 0.0 }
  0x70   : > { %v295_v50 = vmul.f32 %v464_v48, %v294_v49 }
  0x72   : > { %v296_v51 = vmul.f32 %v295_v50, %v230_v0  ;;  %v299_v52 = vmul.f32 %v423_v1, %v295_v50  ;;  %v303_v53 = vmul.f32 %v424_v2, %v295_v50 }
  0x74   : > { %297 = vst.msk [vmem:[%s229_s26] sm:$0xff] %vm249_vm2, %v296_v51  ;;  %427 = vst.msk [vmem:[%s229_s26 + $0x8] sm:$0xff] %vm249_vm2, %v299_v52 }
  0x75   : > { %429 = vst.msk [vmem:[%s229_s26 + $0x10] sm:$0xff] %vm249_vm2, %v303_v53 }
  0x76 PF: > { %s13_s14 = sadd.s32 1, %s487_s14   ;;  %s564_s12 = smov %s483_s13 }
  0x77   : > { %p10_p5 = scmp.ge.s32.totalorder %s13_s14, 4   ;;  %s565_s13 = smov %s567_s15 }
  0x79   :  { %12 = sbr.rel (!%p10_p5) target bundleno = 2 (0x2), region = 72 }

</bundles_post_ra>
